<compile_context>
chip_gen: v7x
topology: tpu7x:2x2x1
jax: 0.10.0
libtpu: 0.0.40
codegen_flags: <defaults>
</compile_context>

<pallas_src>
import math
import functools

import jax
import jax.numpy as jnp
from jax.experimental import pallas as pl
from jax.experimental.pallas import tpu as pltpu

_INV_SQRT2 = 1.0 / math.sqrt(2.0)
_HALF_PI = math.pi / 2.0


def _gelu_exact(x):
    # PyTorch nn.GELU() default (exact, erf-based).
    return 0.5 * x * (1.0 + jax.lax.erf(x * _INV_SQRT2))


def _round_up(x, m):
    return ((x + m - 1) // m) * m


def _tensorcores_per_chip():
    # v7x has 2 TensorCores per chip; split the batch grid so the "parallel"
    # axis actually feeds both. Defensive: fall back to 1 if the query fails.
    try:
        info = pltpu.get_tpu_info()
        for name in ("num_cores", "tensor_cores_per_chip", "cores_per_chip",
                     "num_tensorcores"):
            v = getattr(info, name, None)
            if v:
                return int(v)
    except Exception:
        pass
    return 1


def _batch_tiling(batch):
    """Pick (tile, padded_batch): tile is a multiple of 8, capped at 256
    (bigger tiles spill the vreg file; tiny tiles are step-overhead bound),
    minimizing batch padding. On multi-TC chips force >= 2 grid steps."""
    b8 = _round_up(max(batch, 1), 8)
    max_tb = min(256, b8)
    if _tensorcores_per_chip() > 1 and b8 >= 16:
        max_tb = min(max_tb, max(8, _round_up(b8 // 2, 8)))
    best_tb, best_pad = None, None
    for tb in range(max_tb, 7, -8):
        pad = _round_up(b8, tb)
        if best_pad is None or pad < best_pad:
            best_tb, best_pad = tb, pad
        if pad == b8:          # exact fit with the largest such tile -> done
            break
    return best_tb, best_pad


# --------------------------- fused forward kernel ---------------------------
def _fused_forward_kernel(*refs, input_dim, p_dim, n_fan):
    # refs layout:
    #   gammas_ref                    SMEM (max(n_fan,1),) f32  sigmoid(gate)
    #   x_ref                         VMEM (TB, input_dim)
    #   w_emb_ref, b_emb_ref          VMEM (input_dim, H), (1, H)
    #   [w_cat_ref, b_cat_ref] * n    VMEM (H, H), (1, H) per FAN layer
    #   w_fin_ref, b_fin_ref          VMEM (H, n_pad), (1, n_pad)
    #   o_ref                         VMEM (TB, n_pad)
    gammas_ref = refs[0]
    x_ref, w_emb_ref, b_emb_ref = refs[1], refs[2], refs[3]
    fan_refs = refs[4:4 + 2 * n_fan]
    w_fin_ref, b_fin_ref, o_ref = refs[4 + 2 * n_fan:]

    x = x_ref[...]                       # (TB, input_dim)
    w_emb = w_emb_ref[...]               # (input_dim, H)
    tb = x.shape[0]
    hidden = w_emb.shape[1]

    # ---- embedding ----
    if input_dim <= 16:
        # Tiny contraction dim: VPU broadcast-FMAs instead of a mostly-empty
        # MXU pass.
        h = jnp.broadcast_to(b_emb_ref[...], (tb, hidden)).astype(jnp.float32)
        for k in range(input_dim):
            h = h + x[:, k:k + 1] * w_emb[k:k + 1, :]
    else:
        h = (jnp.dot(x, w_emb, preferred_element_type=jnp.float32)
             + b_emb_ref[...])

    # Lane mask separating the fourier lanes (first 2*p_dim) from the gelu
    # lanes; hoisted out of the layer loop (broadcast_in_dim is not CSE'd).
    lane = jax.lax.broadcasted_iota(jnp.int32, (1, hidden), 1)
    fourier_mask = lane < (2 * p_dim)

    # ---- gated FAN layers (activation stays resident on-chip) ----
    for l in range(n_fan):
        w_cat = fan_refs[2 * l][...]          # (H, H) = [Wp | -Wp | Wg]
        b_cat = fan_refs[2 * l + 1][...]      # (1, H) = [bp+off | off-bp | bg]

        # One lane-dense MXU matmul emits [p+off, off-p, g_pre].
        pg = jnp.dot(h, w_cat, preferred_element_type=jnp.float32) + b_cat

        gamma = gammas_ref[l]                 # scalar sigmoid(gate) from SMEM

        # Full-width compute + lane-mask select: no cross-lane slices/concats.
        # sin(off - p) == cos(p + pi/2 - off) is already the cosine branch.
        sin_all = jnp.sin(pg)
        gelu_all = _gelu_exact(pg)
        scale = jnp.where(fourier_mask, gamma, 1.0 - gamma)      # (1, H)
        h = scale * jnp.where(fourier_mask, sin_all, gelu_all)   # (TB, H)

    # ---- final linear (weights zero-padded to a lane-dense 128-wide tile) ---
    o_ref[...] = (
        jnp.dot(h, w_fin_ref[...], preferred_element_type=jnp.float32)
        + b_fin_ref[...]
    )


# ----------------------- one-time parameter packing --------------------------
def pack_params(params):
    """Pack parameters once (outside the jitted forward):
      * per-layer Wp/Wg fused into one (H, H) weight with the phase offset and
        the cos-branch sign folded into weights/biases,
      * per-layer scalar gamma = sigmoid(gate) stacked for SMEM,
      * final linear zero-padded to a lane-dense multiple of 128 columns."""
    w_emb, b_emb = params["embed"]
    w_fin, b_fin = params["final"]
    hidden = w_emb.shape[1]
    out_dim = w_fin.shape[1]
    n_pad = max(128, _round_up(out_dim, 128))

    gammas, fan_w, fan_b = [], [], []
    for (wp, bp, wg, bg, offset, gate) in params["fan"]:
        # pg = h @ [Wp | -Wp | Wg] + [bp+off | off-bp | bg]
        #    = [p+off | off-p | g_pre]      where p = h @ Wp + bp
        fan_w.append(jnp.concatenate([wp, -wp, wg], axis=1).astype(jnp.float32))
        fan_b.append(jnp.concatenate([bp + offset, offset - bp, bg])
                     .reshape(1, -1).astype(jnp.float32))
        gammas.append(jax.nn.sigmoid(gate[0]))
    gammas = (jnp.stack(gammas).astype(jnp.float32) if gammas
              else jnp.zeros((1,), jnp.float32))

    w_fin_p = jnp.zeros((hidden, n_pad), jnp.float32).at[:, :out_dim].set(w_fin)
    b_fin_p = jnp.zeros((1, n_pad), jnp.float32).at[:, :out_dim].set(b_fin)

    return {
        "gammas": gammas,
        "w_emb": w_emb.astype(jnp.float32),
        "b_emb": b_emb.reshape(1, -1).astype(jnp.float32),
        "fan_w": tuple(fan_w),
        "fan_b": tuple(fan_b),
        "w_fin": w_fin_p,
        "b_fin": b_fin_p,
    }


# ------------------------------- forward -------------------------------------
@functools.partial(jax.jit, static_argnames=("out_dim",))
def fused_forward(packed, x, *, out_dim):
    """Full forward pass in one pallas_call (params already packed)."""
    w_emb, b_emb = packed["w_emb"], packed["b_emb"]
    w_fin, b_fin = packed["w_fin"], packed["b_fin"]
    gammas = packed["gammas"]
    fan_w, fan_b = packed["fan_w"], packed["fan_b"]

    B, input_dim = x.shape
    hidden = w_emb.shape[1]
    n_pad = w_fin.shape[1]
    p_dim = hidden // 4
    n_fan = len(fan_w)

    tb, b_pad = _batch_tiling(B)
    if b_pad != B:
        x = jnp.pad(x, ((0, b_pad - B), (0, 0)))
    grid = (b_pad // tb,)

    fan_args = []
    for w, b in zip(fan_w, fan_b):
        fan_args += [w, b]
    args = [gammas, x, w_emb, b_emb, *fan_args, w_fin, b_fin]

    smem = pl.BlockSpec(memory_space=pltpu.MemorySpace.SMEM)

    def whole(a):  # whole-array resident in VMEM, constant across the grid
        return pl.BlockSpec(a.shape, lambda i, nd=a.ndim: (0,) * nd)

    in_specs = [smem,
                pl.BlockSpec((tb, input_dim), lambda i: (i, 0)),
                whole(w_emb), whole(b_emb)]
    in_specs += [whole(a) for a in fan_args]
    in_specs += [whole(w_fin), whole(b_fin)]
    out_specs = pl.BlockSpec((tb, n_pad), lambda i: (i, 0))

    kernel = functools.partial(_fused_forward_kernel, input_dim=input_dim,
                               p_dim=p_dim, n_fan=n_fan)

    out = pl.pallas_call(
        kernel,
        out_shape=jax.ShapeDtypeStruct((b_pad, n_pad), jnp.float32),
        grid=grid,
        in_specs=in_specs,
        out_specs=out_specs,
        compiler_params=pltpu.CompilerParams(
            dimension_semantics=("parallel",)),
    )(*args)
    return out[:B, :out_dim]


# ------------------------------ parameters ----------------------------------
def init_params(key, input_dim, hidden_dim, output_dim, num_layers):
    assert hidden_dim % 4 == 0, "hidden_dim must be divisible by 4"
    p_dim = hidden_dim // 4
    g_dim = hidden_dim // 2
    assert 2 * p_dim + g_dim == hidden_dim

    def lin_init(k, fan_in, fan_out):
        k1, k2 = jax.random.split(k)
        bound = 1.0 / math.sqrt(fan_in)
        w = jax.random.uniform(k1, (fan_in, fan_out), jnp.float32, -bound, bound)
        b = jax.random.uniform(k2, (fan_out,), jnp.float32, -bound, bound)
        return w, b

    keys = jax.random.split(key, num_layers + 1)
    params = {"embed": lin_init(keys[0], input_dim, hidden_dim), "fan": []}
    for i in range(num_layers - 1):
        kp, kg, kgate = jax.random.split(keys[i + 1], 3)
        wp, bp = lin_init(kp, hidden_dim, p_dim)
        wg, bg = lin_init(kg, hidden_dim, g_dim)
        offset = jnp.full((p_dim,), math.pi / 4.0, jnp.float32)
        gate = jax.random.normal(kgate, (1,), jnp.float32)
        params["fan"].append((wp, bp, wg, bg, offset, gate))
    params["final"] = lin_init(keys[-1], hidden_dim, output_dim)
    return params


# --------------------------- pure-JAX reference ------------------------------
def forward_ref(params, x):
    hp = jax.lax.Precision.HIGHEST
    w, b = params["embed"]
    x = jnp.dot(x, w, precision=hp) + b
    for wp, bp, wg, bg, offset, gate in params["fan"]:
        p = jnp.dot(x, wp, precision=hp) + bp
        g = _gelu_exact(jnp.dot(x, wg, precision=hp) + bg)
        gamma = jax.nn.sigmoid(gate[0])
        sin_part = jnp.sin(p + offset)
        cos_part = jnp.cos(p + _HALF_PI - offset)
        fourier = gamma * jnp.concatenate([sin_part, cos_part], axis=-1)
        nonlinear = (1.0 - gamma) * g
        x = jnp.concatenate([fourier, nonlinear], axis=-1)
    w, b = params["final"]
    return jnp.dot(x, w, precision=hp) + b


if __name__ == "__main__":
    input_dim, hidden_dim, output_dim, num_layers = 4, 128, 4, 3

    key = jax.random.PRNGKey(0)
    kx, kp = jax.random.split(key)
    params = init_params(kp, input_dim, hidden_dim, output_dim, num_layers)
    packed = pack_params(params)      # one-time packing, outside the jit

    # aligned batch
    batch = 8
    x = jax.random.normal(kx, (batch, input_dim), jnp.float32)
    out = jax.block_until_ready(fused_forward(packed, x, out_dim=output_dim))
    ref = forward_ref(params, x)
    assert out.shape == (batch, output_dim)
    assert jnp.allclose(out, ref, rtol=1e-4, atol=1e-4), "mismatch vs reference"

    # ragged batch exercises the pad-to-tile path
    batch2 = 10
    x2 = jax.random.normal(jax.random.PRNGKey(1), (batch2, input_dim),
                           jnp.float32)
    out2 = jax.block_until_ready(fused_forward(packed, x2, out_dim=output_dim))
    ref2 = forward_ref(params, x2)
    assert out2.shape == (batch2, output_dim)
    assert jnp.allclose(out2, ref2, rtol=1e-4, atol=1e-4), \
        "mismatch vs reference (ragged batch)"

    print("KERNEL_OK")
</pallas_src>

<mosaic_0001>
module attributes {stable_mosaic.version = 11 : i64} {
  func.func @_fused_forward_kernel(%arg0: i32, %arg1: memref<2xf32, #tpu.memory_space<smem>>, %arg2: memref<8x4xf32, #tpu.memory_space<vmem>>, %arg3: memref<4x128xf32, #tpu.memory_space<vmem>>, %arg4: memref<1x128xf32, #tpu.memory_space<vmem>>, %arg5: memref<128x128xf32, #tpu.memory_space<vmem>>, %arg6: memref<1x128xf32, #tpu.memory_space<vmem>>, %arg7: memref<128x128xf32, #tpu.memory_space<vmem>>, %arg8: memref<1x128xf32, #tpu.memory_space<vmem>>, %arg9: memref<128x128xf32, #tpu.memory_space<vmem>>, %arg10: memref<1x128xf32, #tpu.memory_space<vmem>>, %arg11: memref<8x128xf32, #tpu.memory_space<vmem>>) attributes {dimension_semantics = [#tpu.dimension_semantics<parallel>], iteration_bounds = array<i64: 1>, scalar_prefetch = 0 : i64, scratch_operands = 0 : i64, tpu.core_type = #tpu.core_type<tc>, window_params = [{transform_indices = @transform_0, window_bounds = array<i64: 2>}, {transform_indices = @transform_1, window_bounds = array<i64: 8, 4>}, {pipeline_mode = #tpu.pipeline_mode<synchronous>, transform_indices = @transform_2, window_bounds = array<i64: 4, 128>}, {pipeline_mode = #tpu.pipeline_mode<synchronous>, transform_indices = @transform_3, window_bounds = array<i64: 1, 128>}, {pipeline_mode = #tpu.pipeline_mode<synchronous>, transform_indices = @transform_4, window_bounds = array<i64: 128, 128>}, {pipeline_mode = #tpu.pipeline_mode<synchronous>, transform_indices = @transform_5, window_bounds = array<i64: 1, 128>}, {pipeline_mode = #tpu.pipeline_mode<synchronous>, transform_indices = @transform_6, window_bounds = array<i64: 128, 128>}, {pipeline_mode = #tpu.pipeline_mode<synchronous>, transform_indices = @transform_7, window_bounds = array<i64: 1, 128>}, {pipeline_mode = #tpu.pipeline_mode<synchronous>, transform_indices = @transform_8, window_bounds = array<i64: 128, 128>}, {pipeline_mode = #tpu.pipeline_mode<synchronous>, transform_indices = @transform_9, window_bounds = array<i64: 1, 128>}, {transform_indices = @transform_10, window_bounds = array<i64: 8, 128>}]} {
    %c0 = arith.constant 0 : index
    %c0_0 = arith.constant 0 : index
    %0 = vector.load %arg2[%c0, %c0_0] : memref<8x4xf32, #tpu.memory_space<vmem>>, vector<8x4xf32>
    %c0_1 = arith.constant 0 : index
    %c0_2 = arith.constant 0 : index
    %1 = vector.load %arg3[%c0_1, %c0_2] : memref<4x128xf32, #tpu.memory_space<vmem>>, vector<4x128xf32>
    %c0_3 = arith.constant 0 : index
    %c0_4 = arith.constant 0 : index
    %2 = vector.load %arg4[%c0_3, %c0_4] : memref<1x128xf32, #tpu.memory_space<vmem>>, vector<1x128xf32>
    %3 = vector.shape_cast %2 : vector<1x128xf32> to vector<1x128xf32>
    %4 = vector.broadcast %3 : vector<1x128xf32> to vector<8x128xf32>
    %5 = vector.extract_strided_slice %0 {offsets = [0, 0], sizes = [8, 1], strides = [1, 1]} : vector<8x4xf32> to vector<8x1xf32>
    %6 = vector.extract_strided_slice %1 {offsets = [0, 0], sizes = [1, 128], strides = [1, 1]} : vector<4x128xf32> to vector<1x128xf32>
    %7 = vector.broadcast %5 : vector<8x1xf32> to vector<8x128xf32>
    %8 = vector.broadcast %6 : vector<1x128xf32> to vector<8x128xf32>
    %9 = arith.mulf %7, %8 : vector<8x128xf32>
    %10 = arith.addf %4, %9 : vector<8x128xf32>
    %11 = vector.extract_strided_slice %0 {offsets = [0, 1], sizes = [8, 1], strides = [1, 1]} : vector<8x4xf32> to vector<8x1xf32>
    %12 = vector.extract_strided_slice %1 {offsets = [1, 0], sizes = [1, 128], strides = [1, 1]} : vector<4x128xf32> to vector<1x128xf32>
    %13 = vector.broadcast %11 : vector<8x1xf32> to vector<8x128xf32>
    %14 = vector.broadcast %12 : vector<1x128xf32> to vector<8x128xf32>
    %15 = arith.mulf %13, %14 : vector<8x128xf32>
    %16 = arith.addf %10, %15 : vector<8x128xf32>
    %17 = vector.extract_strided_slice %0 {offsets = [0, 2], sizes = [8, 1], strides = [1, 1]} : vector<8x4xf32> to vector<8x1xf32>
    %18 = vector.extract_strided_slice %1 {offsets = [2, 0], sizes = [1, 128], strides = [1, 1]} : vector<4x128xf32> to vector<1x128xf32>
    %19 = vector.broadcast %17 : vector<8x1xf32> to vector<8x128xf32>
    %20 = vector.broadcast %18 : vector<1x128xf32> to vector<8x128xf32>
    %21 = arith.mulf %19, %20 : vector<8x128xf32>
    %22 = arith.addf %16, %21 : vector<8x128xf32>
    %23 = vector.extract_strided_slice %0 {offsets = [0, 3], sizes = [8, 1], strides = [1, 1]} : vector<8x4xf32> to vector<8x1xf32>
    %24 = vector.extract_strided_slice %1 {offsets = [3, 0], sizes = [1, 128], strides = [1, 1]} : vector<4x128xf32> to vector<1x128xf32>
    %25 = vector.broadcast %23 : vector<8x1xf32> to vector<8x128xf32>
    %26 = vector.broadcast %24 : vector<1x128xf32> to vector<8x128xf32>
    %27 = arith.mulf %25, %26 : vector<8x128xf32>
    %28 = arith.addf %22, %27 : vector<8x128xf32>
    %29 = tpu.iota {dimensions = array<i32: 1>} : vector<1x128xi32>
    %c64_i32 = arith.constant 64 : i32
    %30 = vector.broadcast %c64_i32 : i32 to vector<1x128xi32>
    %31 = arith.cmpi slt, %29, %30 : vector<1x128xi32>
    %c0_5 = arith.constant 0 : index
    %c0_6 = arith.constant 0 : index
    %32 = vector.load %arg5[%c0_5, %c0_6] : memref<128x128xf32, #tpu.memory_space<vmem>>, vector<128x128xf32>
    %c0_7 = arith.constant 0 : index
    %c0_8 = arith.constant 0 : index
    %33 = vector.load %arg6[%c0_7, %c0_8] : memref<1x128xf32, #tpu.memory_space<vmem>>, vector<1x128xf32>
    %cst = arith.constant dense<0.000000e+00> : vector<8x128xf32>
    %34 = tpu.matmul %28, %32, %cst {dimension_numbers = #tpu.dot_dimension_numbers<[1], [0], [0], [1], [0, 0, 1, 1], [], []>} : vector<8x128xf32>, vector<128x128xf32>, vector<8x128xf32> -> vector<8x128xf32>
    %35 = vector.broadcast %33 : vector<1x128xf32> to vector<8x128xf32>
    %36 = arith.addf %34, %35 : vector<8x128xf32>
    %c0_9 = arith.constant 0 : index
    %37 = memref.load %arg1[%c0_9] : memref<2xf32, #tpu.memory_space<smem>>
    %38 = math.sin %36 : vector<8x128xf32>
    %cst_10 = arith.constant 5.000000e-01 : f32
    %39 = vector.broadcast %cst_10 : f32 to vector<8x128xf32>
    %40 = arith.mulf %39, %36 : vector<8x128xf32>
    %cst_11 = arith.constant 0.707106769 : f32
    %41 = vector.broadcast %cst_11 : f32 to vector<8x128xf32>
    %42 = arith.mulf %36, %41 : vector<8x128xf32>
    %43 = math.erf %42 : vector<8x128xf32>
    %cst_12 = arith.constant 1.000000e+00 : f32
    %44 = vector.broadcast %cst_12 : f32 to vector<8x128xf32>
    %45 = arith.addf %44, %43 : vector<8x128xf32>
    %46 = arith.mulf %40, %45 : vector<8x128xf32>
    %cst_13 = arith.constant 1.000000e+00 : f32
    %47 = arith.subf %cst_13, %37 : f32
    %48 = vector.broadcast %37 : f32 to vector<1x128xf32>
    %49 = vector.broadcast %47 : f32 to vector<1x128xf32>
    %50 = arith.select %31, %48, %49 : vector<1x128xi1>, vector<1x128xf32>
    %51 = vector.shape_cast %31 : vector<1x128xi1> to vector<1x128xi1>
    %52 = vector.broadcast %51 : vector<1x128xi1> to vector<8x128xi1>
    %53 = arith.select %52, %38, %46 : vector<8x128xi1>, vector<8x128xf32>
    %54 = vector.broadcast %50 : vector<1x128xf32> to vector<8x128xf32>
    %55 = arith.mulf %54, %53 : vector<8x128xf32>
    %c0_14 = arith.constant 0 : index
    %c0_15 = arith.constant 0 : index
    %56 = vector.load %arg7[%c0_14, %c0_15] : memref<128x128xf32, #tpu.memory_space<vmem>>, vector<128x128xf32>
    %c0_16 = arith.constant 0 : index
    %c0_17 = arith.constant 0 : index
    %57 = vector.load %arg8[%c0_16, %c0_17] : memref<1x128xf32, #tpu.memory_space<vmem>>, vector<1x128xf32>
    %cst_18 = arith.constant dense<0.000000e+00> : vector<8x128xf32>
    %58 = tpu.matmul %55, %56, %cst_18 {dimension_numbers = #tpu.dot_dimension_numbers<[1], [0], [0], [1], [0, 0, 1, 1], [], []>} : vector<8x128xf32>, vector<128x128xf32>, vector<8x128xf32> -> vector<8x128xf32>
    %59 = vector.broadcast %57 : vector<1x128xf32> to vector<8x128xf32>
    %60 = arith.addf %58, %59 : vector<8x128xf32>
    %c1 = arith.constant 1 : index
    %61 = memref.load %arg1[%c1] : memref<2xf32, #tpu.memory_space<smem>>
    %62 = math.sin %60 : vector<8x128xf32>
    %cst_19 = arith.constant 5.000000e-01 : f32
    %63 = vector.broadcast %cst_19 : f32 to vector<8x128xf32>
    %64 = arith.mulf %63, %60 : vector<8x128xf32>
    %cst_20 = arith.constant 0.707106769 : f32
    %65 = vector.broadcast %cst_20 : f32 to vector<8x128xf32>
    %66 = arith.mulf %60, %65 : vector<8x128xf32>
    %67 = math.erf %66 : vector<8x128xf32>
    %cst_21 = arith.constant 1.000000e+00 : f32
    %68 = vector.broadcast %cst_21 : f32 to vector<8x128xf32>
    %69 = arith.addf %68, %67 : vector<8x128xf32>
    %70 = arith.mulf %64, %69 : vector<8x128xf32>
    %cst_22 = arith.constant 1.000000e+00 : f32
    %71 = arith.subf %cst_22, %61 : f32
    %72 = vector.broadcast %61 : f32 to vector<1x128xf32>
    %73 = vector.broadcast %71 : f32 to vector<1x128xf32>
    %74 = arith.select %31, %72, %73 : vector<1x128xi1>, vector<1x128xf32>
    %75 = vector.shape_cast %31 : vector<1x128xi1> to vector<1x128xi1>
    %76 = vector.broadcast %75 : vector<1x128xi1> to vector<8x128xi1>
    %77 = arith.select %76, %62, %70 : vector<8x128xi1>, vector<8x128xf32>
    %78 = vector.broadcast %74 : vector<1x128xf32> to vector<8x128xf32>
    %79 = arith.mulf %78, %77 : vector<8x128xf32>
    %c0_23 = arith.constant 0 : index
    %c0_24 = arith.constant 0 : index
    %80 = vector.load %arg9[%c0_23, %c0_24] : memref<128x128xf32, #tpu.memory_space<vmem>>, vector<128x128xf32>
    %cst_25 = arith.constant dense<0.000000e+00> : vector<8x128xf32>
    %81 = tpu.matmul %79, %80, %cst_25 {dimension_numbers = #tpu.dot_dimension_numbers<[1], [0], [0], [1], [0, 0, 1, 1], [], []>} : vector<8x128xf32>, vector<128x128xf32>, vector<8x128xf32> -> vector<8x128xf32>
    %c0_26 = arith.constant 0 : index
    %c0_27 = arith.constant 0 : index
    %82 = vector.load %arg10[%c0_26, %c0_27] : memref<1x128xf32, #tpu.memory_space<vmem>>, vector<1x128xf32>
    %83 = vector.broadcast %82 : vector<1x128xf32> to vector<8x128xf32>
    %84 = arith.addf %81, %83 : vector<8x128xf32>
    %c0_28 = arith.constant 0 : index
    %c0_29 = arith.constant 0 : index
    %85 = vector.load %arg11[%c0_28, %c0_29] : memref<8x128xf32, #tpu.memory_space<vmem>>, vector<8x128xf32>
    tpu.vector_store %arg11[%c0_28, %c0_29], %84 {strides = array<i32>} : memref<8x128xf32, #tpu.memory_space<vmem>>, vector<8x128xf32>,
    return
  }
  func.func @transform_0(%arg0: i32) -> i32 {
    %c0_i32 = arith.constant 0 : i32
    %c0_i32_0 = arith.constant 0 : i32
    return %c0_i32 : i32
  }
  func.func @transform_1(%arg0: i32) -> (i32, i32) {
    %c0_i32 = arith.constant 0 : i32
    %c0_i32_0 = arith.constant 0 : i32
    return %arg0, %c0_i32 : i32, i32
  }
  func.func @transform_2(%arg0: i32) -> (i32, i32) {
    %c0_i32 = arith.constant 0 : i32
    %c0_i32_0 = arith.constant 0 : i32
    %c0_i32_1 = arith.constant 0 : i32
    return %c0_i32, %c0_i32_0 : i32, i32
  }
  func.func @transform_3(%arg0: i32) -> (i32, i32) {
    %c0_i32 = arith.constant 0 : i32
    %c0_i32_0 = arith.constant 0 : i32
    %c0_i32_1 = arith.constant 0 : i32
    return %c0_i32, %c0_i32_0 : i32, i32
  }
  func.func @transform_4(%arg0: i32) -> (i32, i32) {
    %c0_i32 = arith.constant 0 : i32
    %c0_i32_0 = arith.constant 0 : i32
    %c0_i32_1 = arith.constant 0 : i32
    return %c0_i32, %c0_i32_0 : i32, i32
  }
  func.func @transform_5(%arg0: i32) -> (i32, i32) {
    %c0_i32 = arith.constant 0 : i32
    %c0_i32_0 = arith.constant 0 : i32
    %c0_i32_1 = arith.constant 0 : i32
    return %c0_i32, %c0_i32_0 : i32, i32
  }
  func.func @transform_6(%arg0: i32) -> (i32, i32) {
    %c0_i32 = arith.constant 0 : i32
    %c0_i32_0 = arith.constant 0 : i32
    %c0_i32_1 = arith.constant 0 : i32
    return %c0_i32, %c0_i32_0 : i32, i32
  }
  func.func @transform_7(%arg0: i32) -> (i32, i32) {
    %c0_i32 = arith.constant 0 : i32
    %c0_i32_0 = arith.constant 0 : i32
    %c0_i32_1 = arith.constant 0 : i32
    return %c0_i32, %c0_i32_0 : i32, i32
  }
  func.func @transform_8(%arg0: i32) -> (i32, i32) {
    %c0_i32 = arith.constant 0 : i32
    %c0_i32_0 = arith.constant 0 : i32
    %c0_i32_1 = arith.constant 0 : i32
    return %c0_i32, %c0_i32_0 : i32, i32
  }
  func.func @transform_9(%arg0: i32) -> (i32, i32) {
    %c0_i32 = arith.constant 0 : i32
    %c0_i32_0 = arith.constant 0 : i32
    %c0_i32_1 = arith.constant 0 : i32
    return %c0_i32, %c0_i32_0 : i32, i32
  }
  func.func @transform_10(%arg0: i32) -> (i32, i32) {
    %c0_i32 = arith.constant 0 : i32
    %c0_i32_0 = arith.constant 0 : i32
    return %arg0, %c0_i32 : i32, i32
  }
}

</mosaic_0001>

<bundles_post_ra>
// kernel: fused_forward.1
= control target key start
LH: loop header
LB: loop body
LE: loop exit
PB: predicated region body
PF: predicated region fallthrough
CT: control target
= control target key end

     0   :  { %15 = vsyncpa [#allocation4], 0  ;;  %s1290_s0 = inlined_call_operand.vmem [shape: f32[2], index: 0, kind: input, shape index: {}]   ;;  %s1291_s1 = inlined_call_operand.vmem [shape: f32[8,4], index: 1, kind: input, shape index: {}]   ;;  %s1292_s2 = inlined_call_operand.vmem [shape: f32[4,128], index: 2, kind: input, shape index: {}]   ;;  %s1293_s3 = inlined_call_operand.vmem [shape: f32[1,128], index: 3, kind: input, shape index: {}]   ;;  %s1294_s4 = inlined_call_operand.hbm [shape: f32[128,128], index: 4, kind: input, shape index: {}]   ;;  %s1295_s5 = inlined_call_operand.vmem [shape: f32[1,128], index: 5, kind: input, shape index: {}]   ;;  %s1296_s6 = inlined_call_operand.hbm [shape: f32[128,128], index: 6, kind: input, shape index: {}]   ;;  %s1297_s7 = inlined_call_operand.vmem [shape: f32[1,128], index: 7, kind: input, shape index: {}]   ;;  %s1298_s8 = inlined_call_operand.hbm [shape: f32[128,128], index: 8, kind: input, shape index: {}]   ;;  %s1299_s9 = inlined_call_operand.vmem [shape: f32[1,128], index: 9, kind: input, shape index: {}]   ;;  %s1300_s10 = inlined_call_operand.vmem [shape: f32[8,128], index: 10, kind: output, shape index: {}]  }
   0x1   :  { %16 = vsyncpa [#allocation3], 0 }
   0x2   :  { %17 = vsyncpa [#allocation7], 0  ;;  %s24_s15 = sshll.u32 %s1290_s0, 4  ;;  %s1032_s16 = smov [#allocation6]   ;;  %s25_s15 = int_to_ptr.vmem [resolvable:$true] %s24_s15 }
   0x3   :  { %s53_s17 = sshll.u32 %s1032_s16, 4  ;;  %s948_s20 = scalar_lea.hbm %s1296_s6, 2048  ;;  %s54_s17 = int_to_ptr.vmem [resolvable:$true] %s53_s17 }
   0x4   :  { %p949_p0 = scmp.ne.s32.totalorder %s1296_s6, %s948_s20  ;;  %p952_p1 = scmp.lt.u32.totalorder %s948_s20, %s1296_s6 }
   0x6   :  { %p954_p2 = pnand %p952_p1, %p949_p0 }
   0x8   :  { %957 = shalt.err (!%p954_p2)
}
   0x9   :  { %s958_s25 = scalar_lea.vmem %s54_s17, 2048  ;;  %p963_p4 = scmp.lt.s32.totalorder %s54_s17, %s54_s17 }
   0xa   :  { %p959_p3 = scmp.ne.s32.totalorder %s54_s17, %s958_s25  ;;  %p964_p5 = scmp.lt.s32.totalorder %s958_s25, %s958_s25 }
   0xc   :  { %p965_p6 = por %p964_p5, %p963_p4 }
   0xe   :  { %p966_p7 = pnand %p965_p6, %p959_p3 }
  0x10   :  { %969 = shalt.err (!%p966_p7)
}
  0x11   :  { %s1033_s0 = smov 128   ;;  %s1034_s26 = smov 8  }
  0x12   :  { %59 = dma.hbm_to_vmem [thread:$0]  %s1296_s6, 2048, %s54_s17, [#allocation7], %s1033_s0, %s1033_s0, %s1034_s26  }
  0x13   :  { %s970_s29 = scalar_lea.vmem %s25_s15, 16  ;;  %p975_p9 = scmp.lt.s32.totalorder %s25_s15, %s25_s15 }
  0x14   :  { %p971_p8 = scmp.ne.s32.totalorder %s25_s15, %s970_s29  ;;  %p976_p10 = scmp.lt.s32.totalorder %s970_s29, %s970_s29 }
  0x16   :  { %p977_p11 = por %p976_p10, %p975_p9 }
  0x18   :  { %p978_p12 = pnand %p977_p11, %p971_p8 }
  0x1a   :  { %981 = shalt.err (!%p978_p12)
}
  0x1b   :  { %s1035_s30 = smov [#allocation2]   ;;  %s1036_s11 = smov [#allocation5]  }
  0x1c   :  { %27 = dma.vmem_to_smem %s25_s15, 16, %s1035_s30, [#allocation4]  }
  0x1d   :  { %s39_s12 = sshll.u32 %s1036_s11, 4  ;;  %s1037_s13 = smov [#allocation8]   ;;  %s40_s12 = int_to_ptr.vmem [resolvable:$true] %s39_s12 }
  0x1e   :  { %s67_s14 = sshll.u32 %s1037_s13, 4  ;;  %s982_s6 = scalar_lea.hbm %s1294_s4, 2048  ;;  %s1124_s14 = int_to_ptr.vmem [resolvable:$true] %s67_s14 }
  0x1f   :  { %p983_p13 = scmp.ne.s32.totalorder %s1294_s4, %s982_s6  ;;  %p986_p0 = scmp.lt.u32.totalorder %s982_s6, %s1294_s4 }
  0x21   :  { %p988_p1 = pnand %p986_p0, %p983_p13 }
  0x23   :  { %991 = shalt.err (!%p988_p1)
}
  0x24   :  { %s992_s15 = scalar_lea.vmem %s40_s12, 2048  ;;  %p997_p3 = scmp.lt.s32.totalorder %s40_s12, %s40_s12 }
  0x25   :  { %p993_p2 = scmp.ne.s32.totalorder %s40_s12, %s992_s15  ;;  %p998_p4 = scmp.lt.s32.totalorder %s992_s15, %s992_s15 }
  0x27   :  { %p999_p5 = por %p998_p4, %p997_p3 }
  0x29   :  { %p1000_p6 = pnand %p999_p5, %p993_p2 }
  0x2b   :  { %1003 = shalt.err (!%p1000_p6)
}
  0x2c   :  { %45 = dma.hbm_to_vmem [thread:$0]  %s1294_s4, 2048, %s40_s12, [#allocation3], %s1033_s0, %s1033_s0, %s1034_s26  }
  0x2d   :  { %s1004_s27 = scalar_lea.hbm %s1298_s8, 2048 }
  0x2e   :  { %p1005_p7 = scmp.ne.s32.totalorder %s1298_s8, %s1004_s27  ;;  %p1008_p8 = scmp.lt.u32.totalorder %s1004_s27, %s1298_s8 }
  0x30   :  { %p1010_p9 = pnand %p1008_p8, %p1005_p7 }
  0x32   :  { %1013 = shalt.err (!%p1010_p9)
}
  0x33   :  { %s1014_s13 = scalar_lea.vmem %s1124_s14, 2048  ;;  %p1019_p11 = scmp.lt.s32.totalorder %s1124_s14, %s1124_s14 }
  0x34   :  { %p1015_p10 = scmp.ne.s32.totalorder %s1124_s14, %s1014_s13  ;;  %p1020_p12 = scmp.lt.s32.totalorder %s1014_s13, %s1014_s13 }
  0x36   :  { %p1021_p13 = por %p1020_p12, %p1019_p11 }
  0x38   :  { %p1022_p0 = pnand %p1021_p13, %p1015_p10 }
  0x3a   :  { %1025 = shalt.err (!%p1022_p0)
}
  0x3b   :  { %73 = dma.hbm_to_vmem [thread:$0]  %s1298_s8, 2048, %s1124_s14, [#allocation7], %s1033_s0, %s1033_s0, %s1034_s26  }
  0x3c   :  { %1026 = dma.done.wait [#allocation4], 16  }
  0x3d   :  { %1027 = vsyncadd [#allocation4], 4294967280 }
  0x3e   :  { %1028 = dma.done.wait [#allocation3], 2048  }
  0x3f   :  { %1029 = vsyncadd [#allocation3], 4294965248 }
  0x40   :  { %1030 = dma.done.wait [#allocation7], 4096  }
  0x41   :  { %1031 = vsyncadd [#allocation7], 4294963200 }
  0x42   :  { %88 = sfence }
  0x43   :  { %v89_v0 = vld [vmem:[%s1291_s1] sm:$0xff]  ;;  %v1038_v2 = vmov 0   ;;  %v1039_v3 = vmov 2   ;;  %v143_v4 = vld [vmem:[#allocation5 + $0x8] sm:$0xff]  ;;  %v144_v5 = vld [vmem:[#allocation5 + $0x10] sm:$0xff]  ;;  %v1040_v8 = vmov 0.0|0.0   ;;  %v103_v31 = vlaneseq }
  0x44   :  { %v142_v1 = vld [vmem:[#allocation5] sm:$0xff]  ;;  %931 = vset.pattern.permute.xlu0 %v1038_v2  ;;  %933 = vset.pattern.permute.xlu1 %v1039_v3  ;;  %v145_v6 = vld [vmem:[#allocation5 + $0x18] sm:$0xff]  ;;  %v147_v11 = vld [vmem:[#allocation5 + $0x28] sm:$0xff]  ;;  %v1041_v12 = vmov 1   ;;  %v1042_v13 = vmov 3   ;;  %vm1043_vm0 = vmmov 0  }
  0x45   :  { %100 = vperm.xlu0 %931, %v89_v0   ;;  %120 = vperm.xlu1 %933, %v89_v0   ;;  %v833_v7 = vpack.c.bf16 %v143_v4, %v142_v1  ;;  %v836_v9 = vpack.c.bf16 %v145_v6, %v144_v5  ;;  %v146_v10 = vld [vmem:[#allocation5 + $0x20] sm:$0xff]  ;;  %v148_v15 = vld [vmem:[#allocation5 + $0x30] sm:$0xff]  ;;  %v149_v16 = vld [vmem:[#allocation5 + $0x38] sm:$0xff]  ;;  %v1044_v20 = vmov 0.0   ;;  %v104_v32 = vshrl.u32 %v103_v31, 7 }
  0x46   :  { %832 = vmatprep.subr.bf16.mxu0 %v1040_v8  ;;  %856 = vmatprep.subr.bf16.mxu1 %v1040_v8  ;;  %v839_v14 = vpack.c.bf16 %v147_v11, %v146_v10  ;;  %v842_v17 = vpack.c.bf16 %v149_v16, %v148_v15  ;;  %v150_v18 = vld [vmem:[#allocation5 + $0x40] sm:$0xff]  ;;  %v151_v19 = vld [vmem:[#allocation5 + $0x48] sm:$0xff]  ;;  %v152_v22 = vld [vmem:[#allocation5 + $0x50] sm:$0xff] }
  0x47   :  { %834 = vmatpush3.bf16.msra.mxu0 %v833_v7  ;;  %759 = vmatprep.mubr.msk.f32.mxu0 %vm1043_vm0, %v1044_v20  ;;  %v845_v21 = vpack.c.bf16 %v151_v19, %v150_v18  ;;  %v153_v23 = vld [vmem:[#allocation5 + $0x58] sm:$0xff]  ;;  %v154_v25 = vld [vmem:[#allocation5 + $0x60] sm:$0xff]  ;;  %v155_v26 = vld [vmem:[#allocation5 + $0x68] sm:$0xff]  ;;  %v105_v33 = vsub.s32 0, %v104_v32  ;;  %v115_v36 = vsub.s32 1, %v104_v32  ;;  %v125_v38 = vsub.s32 2, %v104_v32 }
  0x48   :  { %835 = vmatprep.subr.bf16.mxu0 %v1040_v8  ;;  %794 = vmatprep.mubr.msk.f32.mxu1 %vm1043_vm0, %v1044_v20  ;;  %v848_v24 = vpack.c.bf16 %v153_v23, %v152_v22  ;;  %v851_v27 = vpack.c.bf16 %v155_v26, %v154_v25  ;;  %v156_v28 = vld [vmem:[#allocation5 + $0x70] sm:$0xff]  ;;  %v157_v29 = vld [vmem:[#allocation5 + $0x78] sm:$0xff]  ;;  %v90_v34 = vld [vmem:[%s1292_s2] sm:$0xf]  ;;  %v135_v40 = vsub.s32 3, %v104_v32 }
  0x49   :  { %932 = vset.pattern.permute.xlu0 %v1041_v12  ;;  %934 = vset.pattern.permute.xlu1 %v1042_v13  ;;  %v854_v30 = vpack.c.bf16 %v157_v29, %v156_v28  ;;  %v106_v35 = vrot.slane %v90_v34, %v105_v33  ;;  %v116_v42 = vrot.slane %v90_v34, %v115_v36  ;;  %v663_v43 = vld [vmem:[%s1293_s3] ss:$0 sm:$0xff]  ;;  %v354_v56 = vld [vmem:[#allocation6 + $0x8] sm:$0xff]  ;;  %v355_v57 = vld [vmem:[#allocation6 + $0x10] sm:$0xff]  ;;  %v1046_v33 = vmov 2475754826  }
  0x4a   :  { %110 = vperm.xlu0 %932, %v89_v0   ;;  %130 = vperm.xlu1 %934, %v89_v0   ;;  %v126_v44 = vrot.slane %v90_v34, %v125_v38  ;;  %v136_v45 = vrot.slane %v90_v34, %v135_v40  ;;  %v353_v55 = vld [vmem:[#allocation6] sm:$0xff]  ;;  %v356_v59 = vld [vmem:[#allocation6 + $0x18] sm:$0xff]  ;;  %v358_v62 = vld [vmem:[#allocation6 + $0x28] sm:$0xff]  ;;  %v1047_v36 = vmov 2131351028  }
  0x4b   :  { %837 = vmatpush3.bf16.msra.mxu0 %v836_v9  ;;  %v857_v58 = vpack.c.bf16 %v354_v56, %v353_v55  ;;  %v860_v60 = vpack.c.bf16 %v356_v59, %v355_v57  ;;  %v357_v61 = vld [vmem:[#allocation6 + $0x20] sm:$0xff]  ;;  %v359_v0 = vld [vmem:[#allocation6 + $0x30] sm:$0xff]  ;;  %v360_v1 = vld [vmem:[#allocation6 + $0x38] sm:$0xff] }
  0x4c   :  { %838 = vmatprep.subr.bf16.mxu0 %v1040_v8  ;;  %v863_v63 = vpack.c.bf16 %v358_v62, %v357_v61  ;;  %v866_v2 = vpack.c.bf16 %v360_v1, %v359_v0  ;;  %v361_v3 = vld [vmem:[#allocation6 + $0x40] sm:$0xff]  ;;  %v362_v4 = vld [vmem:[#allocation6 + $0x48] sm:$0xff]  ;;  %v363_v6 = vld [vmem:[#allocation6 + $0x50] sm:$0xff] }
  0x4d   :  { %858 = vmatpush3.bf16.msra.mxu1 %v857_v58  ;;  %v869_v5 = vpack.c.bf16 %v362_v4, %v361_v3  ;;  %v364_v7 = vld [vmem:[#allocation6 + $0x58] sm:$0xff]  ;;  %v365_v10 = vld [vmem:[#allocation6 + $0x60] sm:$0xff]  ;;  %v366_v11 = vld [vmem:[#allocation6 + $0x68] sm:$0xff] }
  0x4e   :  { %935 = vset.pattern.permute.xlu0 %v1042_v13  ;;  %859 = vmatprep.subr.bf16.mxu1 %v1040_v8  ;;  %v872_v9 = vpack.c.bf16 %v364_v7, %v363_v6  ;;  %v875_v12 = vpack.c.bf16 %v366_v11, %v365_v10  ;;  %v367_v13 = vld [vmem:[#allocation6 + $0x70] sm:$0xff]  ;;  %v664_v16 = vld [vmem:[%s1295_s5] ss:$0 sm:$0xff]  ;;  %s235_s5 = sld [smem:[#allocation2]] }
  0x4f   :  { %840 = vmatpush3.bf16.msra.mxu0 %v839_v14  ;;  %v368_v14 = vld [vmem:[#allocation6 + $0x78] sm:$0xff] }
  0x50   :  { %841 = vmatprep.subr.bf16.mxu0 %v1040_v8  ;;  %v878_v15 = vpack.c.bf16 %v368_v14, %v367_v13 }
  0x51   :  { %861 = vmatpush3.bf16.msra.mxu1 %v860_v60 }
  0x52   :  { %862 = vmatprep.subr.bf16.mxu1 %v1040_v8 }
  0x53   :  { %843 = vmatpush3.bf16.msra.mxu0 %v842_v17 }
  0x54   :  { %844 = vmatprep.subr.bf16.mxu0 %v1040_v8  ;;  %s345_s14 = ssub.f32 1.0, %s235_s5 }
  0x55   :  { %864 = vmatpush3.bf16.msra.mxu1 %v863_v63 }
  0x56   :  { %865 = vmatprep.subr.bf16.mxu1 %v1040_v8 }
  0x57   :  { %846 = vmatpush3.bf16.msra.mxu0 %v845_v21 }
  0x58   :  { %847 = vmatprep.subr.bf16.mxu0 %v1040_v8 }
  0x59   :  { %867 = vmatpush3.bf16.msra.mxu1 %v866_v2 }
  0x5a   :  { %868 = vmatprep.subr.bf16.mxu1 %v1040_v8 }
  0x5b   :  { %849 = vmatpush3.bf16.msra.mxu0 %v848_v24 }
  0x5c   :  { %850 = vmatprep.subr.bf16.mxu0 %v1040_v8 }
  0x5d   :  { %870 = vmatpush3.bf16.msra.mxu1 %v869_v5 }
  0x5e   :  { %871 = vmatprep.subr.bf16.mxu1 %v1040_v8 }
  0x5f   :  { %852 = vmatpush3.bf16.msra.mxu0 %v851_v27 }
  0x60   :  { %853 = vmatprep.subr.bf16.mxu0 %v1040_v8 }
  0x61   :  { %873 = vmatpush3.bf16.msra.mxu1 %v872_v9 }
  0x62   :  { %874 = vmatprep.subr.bf16.mxu1 %v1040_v8 }
  0x63   :  { %855 = vmatpush3.bf16.msra.mxu0 %v854_v30  ;;  %v1045_v30 = vmov 683565275  }
  0x64   :  { %880 = vmatprep.subr.bf16.mxu0 %v1040_v8 }
  0x65   :  { %876 = vmatpush3.bf16.msra.mxu1 %v875_v12 }
  0x66   :  { %877 = vmatprep.subr.bf16.mxu1 %v1040_v8 }
  0x69   :  { %879 = vmatpush3.bf16.msra.mxu1 %v878_v15 }
  0xc4   :  { %v101_v37 = vpop.permute.xlu0 %100  ;;  %v121_v39 = vpop.permute.xlu1 %120 }
  0xc5   :  { %v107_v41 = vmul.f32 %v106_v35, %v101_v37  ;;  %v127_v50 = vmul.f32 %v126_v44, %v121_v39  ;;  %v1048_v39 = vmov 2102212464  }
  0xc7   :  { %v108_v48 = vadd.f32 %v663_v43, %v107_v41 }
  0xc9   :  { %v111_v46 = vpop.permute.xlu0 %110  ;;  %v131_v47 = vpop.permute.xlu1 %130 }
  0xca   :  { %v117_v49 = vmul.f32 %v116_v42, %v111_v46  ;;  %v137_v52 = vmul.f32 %v136_v45, %v131_v47  ;;  %v1049_v42 = vmov 920167782   ;;  %v1050_v45 = vmov 1326507024  }
  0xcc   :  { %v118_v51 = vadd.f32 %v117_v49, %v108_v48 }
  0xce   :  { %v128_v53 = vadd.f32 %v127_v50, %v118_v51 }
  0xd0   :  { %v138_v54 = vadd.f32 %v137_v52, %v128_v53 }
  0xd2   :  { %760 = vmatmul.mubr.f32.vlgmr.msra.gmra.mrb[0].mxu0 %v138_v54 }
  0xd3   :  { %829 = vmatprep.mubr.msk.f32.mxu0 %vm1043_vm0, %v1044_v20 }
 0x1a5   :  { %v231_v17 = vpop.f32.mrb[0].mxu0 }
 0x1a6   :  { %v1194_v18 = vadd.f32 %v664_v16, %v231_v17  ;;  %v761_v19 = vpop.f32.mrb[1].mxu0 }
 0x1a8   :  { %v239_v20 = vand.u32 2139095040, %v1194_v18  ;;  %v236_v24 = vand.u32 2147483647, %v1194_v18  ;;  %vm238_vm8 = vcmp.lt.s32.totalorder %v1194_v18, 0  ;;  %vm328_vm14 = vweird.f32 %v1194_v18 }
 0x1aa   :  { %v240_v21 = vshrl.u32 %v239_v20, 23  ;;  %v243_v28 = vand.u32 8388607, %v236_v24  ;;  %vm237_vm9 = vcmp.le.f32.partialorder %v236_v24, 0.7853982 }
 0x1ac   :  { %v665_v22 = vadd.s32 4294967169, %v240_v21  ;;  %v244_v47 = vor.u32 8388608, %v243_v28 }
 0x1ae   :  { %v246_v23 = vadd.s32 1, %v665_v22  ;;  %v284_v61 = vshll.u32 %v244_v47, 8 }
 0x1b0   :  { %vm247_vm1 = vcmp.gt.s32.totalorder %v246_v23, 0 }
 0x1b1   :  { %v248_v25 = vsel %vm247_vm1, %v246_v23, 0 }
 0x1b2   :  { %v250_v26 = vand.u32 31, %v248_v25  ;;  %v249_v29 = vshrl.u32 %v248_v25, 5 }
 0x1b4   :  { %v251_v27 = vsub.s32 32, %v250_v26  ;;  %v253_v32 = vshll.u32 %v1045_v30, %v250_v26  ;;  %v256_v34 = vshll.u32 %v1046_v33, %v250_v26  ;;  %v259_v38 = vshll.u32 %v1047_v36, %v250_v26 }
 0x1b5   :  { %v262_v41 = vshll.u32 %v1048_v39, %v250_v26  ;;  %v265_v44 = vshll.u32 %v1049_v42, %v250_v26  ;;  %vm268_vm2 = vcmp.lt.s32.totalorder %v249_v29, 1  ;;  %vm271_vm3 = vcmp.lt.s32.totalorder %v249_v29, 4 }
 0x1b6   :  { %v254_v35 = vshrl.u32 %v1046_v33, %v251_v27  ;;  %v257_v37 = vshrl.u32 %v1047_v36, %v251_v27  ;;  %v260_v40 = vshrl.u32 %v1048_v39, %v251_v27  ;;  %v263_v43 = vshrl.u32 %v1049_v42, %v251_v27 }
 0x1b7   :  { %v266_v46 = vshrl.u32 %v1050_v45, %v251_v27  ;;  %v252_v56 = vshrl.u32 %v1045_v30, %v251_v27  ;;  %vm270_vm4 = vcmp.lt.s32.totalorder %v249_v29, 3  ;;  %vm269_vm5 = vcmp.lt.s32.totalorder %v249_v29, 2 }
 0x1b8   :  { %v255_v48 = vor.u32 %v254_v35, %v253_v32  ;;  %v258_v49 = vor.u32 %v257_v37, %v256_v34  ;;  %v261_v50 = vor.u32 %v260_v40, %v259_v38  ;;  %v264_v51 = vor.u32 %v263_v43, %v262_v41 }
 0x1b9   :  { %v267_v52 = vor.u32 %v266_v46, %v265_v44  ;;  %v341_v41 = vmul.f32 0.70710677, %v1194_v18 }
 0x1ba   :  { %v273_v53 = vsel %vm271_vm3, %v261_v50, 2102212464  ;;  %v276_v54 = vsel %vm268_vm2, %v255_v48, %v258_v49  ;;  %v280_v55 = vsel %vm268_vm2, %v258_v49, %v261_v50  ;;  %v277_v57 = vsel %vm271_vm3, %v264_v51, 920167782 }
 0x1bb   :  { %v281_v58 = vsel %vm271_vm3, %v267_v52, 1326507024  ;;  %v278_v59 = vsel %vm270_vm4, %v261_v50, %v277_v57  ;;  %v272_v62 = vsel %vm268_vm2, %v252_v56, %v255_v48  ;;  %v274_v63 = vsel %vm270_vm4, %v258_v49, %v273_v53 }
 0x1bc   :  { %v282_v60 = vsel %vm270_vm4, %v264_v51, %v281_v58  ;;  %v279_v0 = vsel %vm269_vm5, %v276_v54, %v278_v59  ;;  %v275_v6 = vsel %vm269_vm5, %v272_v62, %v274_v63  ;;  %936 = verf.f32 %v341_v41 }
 0x1bd   :  { %v283_v1 = vsel %vm269_vm5, %v280_v55, %v282_v60  ;;  %v1214_v4 = vmul.u32.u64.low %v284_v61, %v279_v0  ;;  %v1215_v5 = vmul.u32.u64.high %v284_v61, %v279_v0, %v1214_v4  ;;  %v291_v9 = vmul.u32 %v284_v61, %v275_v6 }
 0x1be   :  { %v1211_v2 = vmul.u32.u64.low %v284_v61, %v283_v1  ;;  %v1212_v3 = vmul.u32.u64.high %v284_v61, %v283_v1, %v1211_v2  ;;  %v1227_v50 = vand.u32 127, %v103_v31  ;;  %v346_v57 = vstv %s235_s5 }
 0x1bf   :  { %v294_v7 = vadd.s32 1, %v1215_v5  ;;  %v347_v58 = vstv %s345_s14  ;;  %v340_v60 = vmul.f32 0.5, %v1194_v18 }
 0x1c0   :  { %vm293_vm6 = vc.u32 %v1212_v3, %v1214_v4  ;;  %v292_v22 = vadd.s32 %v1214_v4, %v1212_v3  ;;  %vm141_vm10 = vcmp.lt.s32.totalorder %v1227_v50, 64  ;;  %v562_v3 = vld [vmem:[#allocation8] sm:$0xff]  ;;  %v563_v4 = vld [vmem:[#allocation8 + $0x8] sm:$0xff] }
 0x1c1   :  { %v295_v10 = vsel %vm293_vm6, %v294_v7, %v1215_v5  ;;  %v348_v63 = vsel %vm141_vm10, %v346_v57, %v347_v58  ;;  %v564_v5 = vld [vmem:[#allocation8 + $0x10] sm:$0xff]  ;;  %v881_v6 = vpack.c.bf16 %v563_v4, %v562_v3  ;;  %v565_v7 = vld [vmem:[#allocation8 + $0x18] sm:$0xff] }
 0x1c2   :  { %v296_v11 = vadd.s32 %v295_v10, %v291_v9  ;;  %v884_v9 = vpack.c.bf16 %v565_v7, %v564_v5  ;;  %v567_v10 = vld [vmem:[#allocation8 + $0x28] sm:$0xff] }
 0x1c3   :  { %882 = vmatpush3.bf16.msra.mxu0 %v881_v6 }
 0x1c4   :  { %v297_v12 = vadd.s32 536870912, %v296_v11  ;;  %883 = vmatprep.subr.bf16.mxu0 %v1040_v8 }
 0x1c6   :  { %v298_v13 = vshrl.u32 %v297_v12, 30  ;;  %v937_v51 = vpop.eup %936  ;;  %v568_v12 = vld [vmem:[#allocation8 + $0x30] sm:$0xff] }
 0x1c7   :  { %v343_v55 = vadd.f32 1.0, %v937_v51  ;;  %885 = vmatpush3.bf16.msra.mxu0 %v884_v9 }
 0x1c8   :  { %v299_v14 = vshll.u32 %v298_v13, 30  ;;  %v322_v40 = vsub.s32 4, %v298_v13  ;;  %886 = vmatprep.subr.bf16.mxu0 %v1040_v8 }
 0x1c9   :  { %v344_v62 = vmul.f32 %v343_v55, %v340_v60 }
 0x1ca   :  { %v300_v15 = vsub.s32 %v296_v11, %v299_v14  ;;  %v323_v46 = vsel %vm238_vm8, %v322_v40, %v298_v13  ;;  %v569_v13 = vld [vmem:[#allocation8 + $0x38] sm:$0xff] }
 0x1cb   :  { %v325_v48 = vsel %vm237_vm9, 0, %v323_v46  ;;  %v890_v14 = vpack.c.bf16 %v569_v13, %v568_v12 }
 0x1cc   :  { %v302_v16 = vsub.s32 0, %v300_v15  ;;  %v329_v49 = vadd.s32 3, %v325_v48 }
 0x1ce   :  { %v666_v17 = vmin.u32 %v302_v16, %v300_v15  ;;  %v330_v52 = vand.u32 3, %v329_v49  ;;  %v571_v16 = vld [vmem:[#allocation8 + $0x48] sm:$0xff] }
 0x1d0   :  { %v304_v19 = vclz %v666_v17  ;;  %vm335_vm11 = vcmp.eq.s32.totalorder %v330_v52, 2  ;;  %vm332_vm12 = vcmp.eq.s32.totalorder %v330_v52, 0  ;;  %vm331_vm13 = vcmp.lt.s32.totalorder %v330_v52, 2 }
 0x1d2   :  { %v667_v20 = vadd.s32 4294967294, %v304_v19  ;;  %v572_v19 = vld [vmem:[#allocation8 + $0x50] sm:$0xff] }
 0x1d4   :  { %vm668_vm7 = vcmp.lt.s32.totalorder %v667_v20, 0 }
 0x1d5   :  { %v307_v21 = vsel %vm668_vm7, 0, %v667_v20  ;;  %v573_v20 = vld [vmem:[#allocation8 + $0x58] sm:$0xff] }
 0x1d6   :  { %v308_v23 = vsub.s32 32, %v307_v21  ;;  %v312_v25 = vsub.s32 4294967266, %v307_v21  ;;  %v309_v26 = vshll.u32 %v300_v15, %v307_v21  ;;  %v570_v15 = vld [vmem:[#allocation8 + $0x40] sm:$0xff]  ;;  %v896_v21 = vpack.c.bf16 %v573_v20, %v572_v19 }
 0x1d7   :  { %v893_v17 = vpack.c.bf16 %v571_v16, %v570_v15 }
 0x1d8   :  { %v310_v27 = vshrl.u32 %v292_v22, %v308_v23  ;;  %v313_v28 = vadd.s32 127, %v312_v25  ;;  %v574_v22 = vld [vmem:[#allocation8 + $0x60] sm:$0xff]  ;;  %v575_v23 = vld [vmem:[#allocation8 + $0x68] sm:$0xff] }
 0x1d9   :  { %v899_v25 = vpack.c.bf16 %v575_v23, %v574_v22 }
 0x1da   :  { %v311_v29 = vor.u32 %v310_v27, %v309_v26  ;;  %v314_v32 = vshll.u32 %v313_v28, 23  ;;  %v576_v26 = vld [vmem:[#allocation8 + $0x70] sm:$0xff]  ;;  %v577_v27 = vld [vmem:[#allocation8 + $0x78] sm:$0xff] }
 0x1db   :  { %v902_v28 = vpack.c.bf16 %v577_v27, %v576_v26 }
 0x1dc   :  { %v315_v34 = vor.u32 4788187, %v314_v32  ;;  %v318_v37 = vcvt.s32.f32 %v311_v29  ;;  %v669_v29 = vld [vmem:[%s1297_s7] ss:$0 sm:$0xff]  ;;  %s670_s7 = sld [smem:[#allocation2 + $0x1]] }
 0x1de   :  { %v316_v35 = vand.u32 2147483647, %v315_v34 }
 0x1e0   :  { %v319_v38 = vmul.f32 %v318_v37, %v316_v35 }
 0x1e2   :  { %v320_v43 = vxor.u32 2147483648, %v319_v38  ;;  %s556_s19 = ssub.f32 1.0, %s670_s7 }
 0x1e4   :  { %v321_v44 = vsel %vm238_vm8, %v320_v43, %v319_v38 }
 0x1e5   :  { %v324_v47 = vsel %vm237_vm9, %v1194_v18, %v321_v44  ;;  %v566_v18 = vld [vmem:[#allocation8 + $0x20] sm:$0xff] }
 0x1e6   :  { %938 = vcosq.f32 %v324_v47  ;;  %v887_v11 = vpack.c.bf16 %v567_v10, %v566_v18 }
 0x1e7   :  { %940 = vsinq.f32 %v324_v47 }
 0x1e8   :  { %888 = vmatpush3.bf16.msra.mxu0 %v887_v11 }
 0x1e9   :  { %889 = vmatprep.subr.bf16.mxu0 %v1040_v8 }
 0x1ec   :  { %891 = vmatpush3.bf16.msra.mxu0 %v890_v14 }
 0x1ed   :  { %892 = vmatprep.subr.bf16.mxu0 %v1040_v8 }
 0x1f0   :  { %v939_v53 = vpop.eup %938  ;;  %894 = vmatpush3.bf16.msra.mxu0 %v893_v17 }
 0x1f1   :  { %v941_v54 = vpop.eup %940  ;;  %v336_v24 = vxor.u32 2147483648, %v939_v53  ;;  %895 = vmatprep.subr.bf16.mxu0 %v1040_v8 }
 0x1f2   :  { %v333_v56 = vxor.u32 2147483648, %v941_v54 }
 0x1f3   :  { %v337_v59 = vsel %vm335_vm11, %v336_v24, %v941_v54 }
 0x1f4   :  { %v334_v31 = vsel %vm332_vm12, %v939_v53, %v333_v56  ;;  %897 = vmatpush3.bf16.msra.mxu0 %v896_v21 }
 0x1f5   :  { %v338_v61 = vsel %vm331_vm13, %v334_v31, %v337_v59  ;;  %898 = vmatprep.subr.bf16.mxu0 %v1040_v8 }
 0x1f6   :  { %v339_v0 = vsel %vm328_vm14, nan, %v338_v61 }
 0x1f7   :  { %v351_v1 = vsel %vm141_vm10, %v339_v0, %v344_v62 }
 0x1f8   :  { %v352_v2 = vmul.f32 %v351_v1, %v348_v63  ;;  %900 = vmatpush3.bf16.msra.mxu0 %v899_v25 }
 0x1f9   :  { %901 = vmatprep.subr.bf16.mxu0 %v1040_v8 }
 0x1fa   :  { %795 = vmatmul.mubr.f32.vlgmr.msra.gmra.mrb[0].mxu1 %v352_v2 }
 0x1fc   :  { %903 = vmatpush3.bf16.msra.mxu0 %v902_v28 }
 0x2cd   :  { %v442_v32 = vpop.f32.mrb[0].mxu1 }
 0x2ce   :  { %v1246_v34 = vadd.f32 %v669_v29, %v442_v32  ;;  %v796_v35 = vpop.f32.mrb[1].mxu1 }
 0x2d0   :  { %v450_v37 = vand.u32 2139095040, %v1246_v34  ;;  %v447_v43 = vand.u32 2147483647, %v1246_v34  ;;  %vm449_vm6 = vcmp.lt.s32.totalorder %v1246_v34, 0  ;;  %vm539_vm12 = vweird.f32 %v1246_v34 }
 0x2d2   :  { %v451_v38 = vshrl.u32 %v450_v37, 23  ;;  %v454_v47 = vand.u32 8388607, %v447_v43  ;;  %vm448_vm7 = vcmp.le.f32.partialorder %v447_v43, 0.7853982  ;;  %v557_v43 = vstv %s670_s7 }
 0x2d4   :  { %v671_v40 = vadd.s32 4294967169, %v451_v38  ;;  %v455_v59 = vor.u32 8388608, %v454_v47 }
 0x2d6   :  { %v457_v41 = vadd.s32 1, %v671_v40 }
 0x2d8   :  { %vm458_vm15 = vcmp.gt.s32.totalorder %v457_v41, 0 }
 0x2d9   :  { %v459_v44 = vsel %vm458_vm15, %v457_v41, 0 }
 0x2da   :  { %v461_v46 = vand.u32 31, %v459_v44  ;;  %v460_v48 = vshrl.u32 %v459_v44, 5 }
 0x2dc   :  { %v462_v8 = vsub.s32 32, %v461_v46  ;;  %v464_v49 = vshll.u32 %v1045_v30, %v461_v46  ;;  %v467_v51 = vshll.u32 %v1046_v33, %v461_v46  ;;  %v470_v54 = vshll.u32 %v1047_v36, %v461_v46 }
 0x2dd   :  { %v473_v55 = vshll.u32 %v1048_v39, %v461_v46  ;;  %v476_v57 = vshll.u32 %v1049_v42, %v461_v46  ;;  %vm479_vm0 = vcmp.lt.s32.totalorder %v460_v48, 1  ;;  %vm482_vm1 = vcmp.lt.s32.totalorder %v460_v48, 4 }
 0x2de   :  { %v465_v52 = vshrl.u32 %v1046_v33, %v462_v8  ;;  %v468_v53 = vshrl.u32 %v1047_v36, %v462_v8  ;;  %v471_v24 = vshrl.u32 %v1048_v39, %v462_v8  ;;  %v474_v56 = vshrl.u32 %v1049_v42, %v462_v8 }
 0x2df   :  { %v477_v58 = vshrl.u32 %v1050_v45, %v462_v8  ;;  %v463_v1 = vshrl.u32 %v1045_v30, %v462_v8  ;;  %vm481_vm2 = vcmp.lt.s32.totalorder %v460_v48, 3  ;;  %vm480_vm3 = vcmp.lt.s32.totalorder %v460_v48, 2 }
 0x2e0   :  { %v466_v60 = vor.u32 %v465_v52, %v464_v49  ;;  %v469_v31 = vor.u32 %v468_v53, %v467_v51  ;;  %v472_v61 = vor.u32 %v471_v24, %v470_v54  ;;  %v475_v62 = vor.u32 %v474_v56, %v473_v55 }
 0x2e1   :  { %v478_v33 = vor.u32 %v477_v58, %v476_v57  ;;  %v495_v45 = vshll.u32 %v455_v59, 8  ;;  %v552_v48 = vmul.f32 0.70710677, %v1246_v34 }
 0x2e2   :  { %v484_v63 = vsel %vm482_vm1, %v472_v61, 2102212464  ;;  %v487_v36 = vsel %vm479_vm0, %v466_v60, %v469_v31  ;;  %v491_v0 = vsel %vm479_vm0, %v469_v31, %v472_v61  ;;  %v488_v39 = vsel %vm482_vm1, %v475_v62, 920167782 }
 0x2e3   :  { %v492_v2 = vsel %vm482_vm1, %v478_v33, 1326507024  ;;  %v489_v42 = vsel %vm481_vm2, %v472_v61, %v488_v39  ;;  %v483_v4 = vsel %vm479_vm0, %v463_v1, %v466_v60  ;;  %v485_v5 = vsel %vm481_vm2, %v469_v31, %v484_v63 }
 0x2e4   :  { %v493_v3 = vsel %vm481_vm2, %v475_v62, %v492_v2  ;;  %v490_v6 = vsel %vm480_vm3, %v487_v36, %v489_v42  ;;  %v486_v12 = vsel %vm480_vm3, %v483_v4, %v485_v5  ;;  %942 = verf.f32 %v552_v48 }
 0x2e5   :  { %v494_v7 = vsel %vm480_vm3, %v491_v0, %v493_v3  ;;  %v1266_v10 = vmul.u32.u64.low %v495_v45, %v490_v6  ;;  %v1267_v11 = vmul.u32.u64.high %v495_v45, %v490_v6, %v1266_v10  ;;  %v502_v13 = vmul.u32 %v495_v45, %v486_v12  ;;  %v675_v3 = vld [vmem:[%s1299_s9] ss:$0 sm:$0xff] }
 0x2e6   :  { %v1263_v9 = vmul.u32.u64.low %v495_v45, %v494_v7  ;;  %v1264_v18 = vmul.u32.u64.high %v495_v45, %v494_v7, %v1263_v9  ;;  %v558_v61 = vstv %s556_s19  ;;  %v551_v33 = vmul.f32 0.5, %v1246_v34 }
 0x2e7   :  { %v505_v30 = vadd.s32 1, %v1267_v11  ;;  %v559_v1 = vsel %vm141_vm10, %v557_v43, %v558_v61 }
 0x2e8   :  { %vm504_vm4 = vc.u32 %v1264_v18, %v1266_v10  ;;  %v503_v27 = vadd.s32 %v1266_v10, %v1264_v18 }
 0x2e9   :  { %v506_v14 = vsel %vm504_vm4, %v505_v30, %v1267_v11 }
 0x2ea   :  { %v507_v15 = vadd.s32 %v506_v14, %v502_v13 }
 0x2ec   :  { %v508_v16 = vadd.s32 536870912, %v507_v15 }
 0x2ee   :  { %v509_v17 = vshrl.u32 %v508_v16, 30  ;;  %v943_v55 = vpop.eup %942 }
 0x2ef   :  { %v554_v60 = vadd.f32 1.0, %v943_v55 }
 0x2f0   :  { %v510_v19 = vshll.u32 %v509_v17, 30  ;;  %v533_v47 = vsub.s32 4, %v509_v17 }
 0x2f1   :  { %v555_v0 = vmul.f32 %v554_v60, %v551_v33 }
 0x2f2   :  { %v511_v20 = vsub.s32 %v507_v15, %v510_v19  ;;  %v534_v52 = vsel %vm449_vm6, %v533_v47, %v509_v17 }
 0x2f3   :  { %v536_v54 = vsel %vm448_vm7, 0, %v534_v52 }
 0x2f4   :  { %v513_v21 = vsub.s32 0, %v511_v20  ;;  %v540_v24 = vadd.s32 3, %v536_v54 }
 0x2f6   :  { %v672_v22 = vmin.u32 %v513_v21, %v511_v20  ;;  %v541_v56 = vand.u32 3, %v540_v24 }
 0x2f8   :  { %v515_v23 = vclz %v672_v22  ;;  %vm546_vm8 = vcmp.eq.s32.totalorder %v541_v56, 2  ;;  %vm543_vm9 = vcmp.eq.s32.totalorder %v541_v56, 0  ;;  %vm542_vm11 = vcmp.lt.s32.totalorder %v541_v56, 2 }
 0x2fa   :  { %v673_v25 = vadd.s32 4294967294, %v515_v23 }
 0x2fc   :  { %vm674_vm5 = vcmp.lt.s32.totalorder %v673_v25, 0 }
 0x2fd   :  { %v518_v26 = vsel %vm674_vm5, 0, %v673_v25 }
 0x2fe   :  { %v519_v28 = vsub.s32 32, %v518_v26  ;;  %v523_v29 = vsub.s32 4294967266, %v518_v26  ;;  %v520_v32 = vshll.u32 %v511_v20, %v518_v26 }
 0x300   :  { %v521_v35 = vshrl.u32 %v503_v27, %v519_v28  ;;  %v524_v37 = vadd.s32 127, %v523_v29 }
 0x302   :  { %v522_v38 = vor.u32 %v521_v35, %v520_v32  ;;  %v525_v40 = vshll.u32 %v524_v37, 23 }
 0x304   :  { %v526_v41 = vor.u32 4788187, %v525_v40  ;;  %v529_v46 = vcvt.s32.f32 %v522_v38 }
 0x306   :  { %v527_v44 = vand.u32 2147483647, %v526_v41 }
 0x308   :  { %v530_v8 = vmul.f32 %v529_v46, %v527_v44 }
 0x30a   :  { %v531_v49 = vxor.u32 2147483648, %v530_v8 }
 0x30c   :  { %v532_v51 = vsel %vm449_vm6, %v531_v49, %v530_v8 }
 0x30d   :  { %v535_v53 = vsel %vm448_vm7, %v1246_v34, %v532_v51 }
 0x30e   :  { %944 = vcosq.f32 %v535_v53 }
 0x30f   :  { %946 = vsinq.f32 %v535_v53 }
 0x318   :  { %v945_v57 = vpop.eup %944 }
 0x319   :  { %v947_v58 = vpop.eup %946  ;;  %v547_v59 = vxor.u32 2147483648, %v945_v57 }
 0x31a   :  { %v544_v31 = vxor.u32 2147483648, %v947_v58 }
 0x31b   :  { %v548_v62 = vsel %vm546_vm8, %v547_v59, %v947_v58 }
 0x31c   :  { %v545_v63 = vsel %vm543_vm9, %v945_v57, %v544_v31 }
 0x31d   :  { %v549_v36 = vsel %vm542_vm11, %v545_v63, %v548_v62 }
 0x31e   :  { %v550_v39 = vsel %vm539_vm12, nan, %v549_v36 }
 0x31f   :  { %v560_v2 = vsel %vm141_vm10, %v550_v39, %v555_v0 }
 0x320   :  { %v561_v42 = vmul.f32 %v560_v2, %v559_v1 }
 0x322   :  { %830 = vmatmul.mubr.f32.vlgmr.msra.gmra.mrb[2].mxu0 %v561_v42 }
 0x3f5   :  { %v651_v45 = vpop.f32.mrb[2].mxu0 }
 0x3f6   :  { %v652_v4 = vadd.f32 %v675_v3, %v651_v45  ;;  %v831_v5 = vpop.f32.mrb[3].mxu0 }
 0x3f8   :  { %655 = vst [vmem:[%s1300_s10] sm:$0xff] %v652_v4 }
 0x3f9   :  { %660 = vsyncpa [#allocation3], 1 }
 0x3fa   :  { %661 = vsyncpa [#allocation7], 1 }
 0x3fb   :  { %662 = vsyncpa [#allocation4], 1 }

</bundles_post_ra>
